<compile_context>
chip_gen: v7x
topology: tpu7x:2x2x1
jax: 0.10.0
libtpu: 0.0.40
codegen_flags: <defaults>
</compile_context>

<pallas_src>
import jax
import jax.numpy as jnp
from jax.experimental import pallas as pl
from jax.experimental.pallas import tpu as pltpu


def _offsetnet_kernel(x_ref, w_ref, p_ref, o_ref):
    # x_ref: (block_n, in_features)        activations
    # w_ref: (in_features, out_features)   Linear weight, transposed vs. PyTorch
    # p_ref: (8, out_features)             row 0 = bias, row 1 = clip_min, row 2 = clip_max
    # o_ref: (block_n, out_features)       output tile (true channel extent, no padding)
    y = jnp.dot(x_ref[...], w_ref[...], preferred_element_type=jnp.float32)
    y = y + p_ref[0:1, :]                 # bias, broadcast over batch
    y = jnp.maximum(y, p_ref[1:2, :])     # torch.clip lower bound (per channel)
    y = jnp.minimum(y, p_ref[2:3, :])     # torch.clip upper bound (valid iff min <= max)
    o_ref[...] = y.astype(o_ref.dtype)


def offsetnet_forward(x, weight_t, bias, clip_values, *, block_n=4096,
                      compute_dtype=jnp.float32, out_dtype=jnp.float32,
                      use_xla_fallback=False):
    """Pallas implementation of offsetNet.forward (depth=0, norm_type='linear').

    x           : (n, ...) float -- flattened to (n, in_features) like torch's reshape(n, -1)
    weight_t    : (in_features, out_features)  (PyTorch nn.Linear weight, transposed)
    bias        : (out_features,)
    clip_values : (out_features, 2), column 0 = min, column 1 = max (min <= max assumed,
                  matching torch.clip semantics)
    block_n     : batch tile size; n <= block_n uses a single no-grid call, larger n is
                  tiled over the batch with "parallel" semantics (megacore sharding).
    compute_dtype: dtype of x / W fed to the MXU.  bfloat16 recommended for inference on
                  v5e/v6e/v7x (halves the dominant x HBM stream; accumulation stays f32).
    out_dtype   : output dtype (bf16 halves the output write if the consumer tolerates it).
    use_xla_fallback: for tiny batches, skip the Pallas kernel entirely and let XLA fuse
                  the matmul+bias+clip into neighboring ops (kernel-boundary cost dominates
                  there).
    """
    n = x.shape[0]
    x2d = x.reshape(n, -1).astype(compute_dtype)   # '_linear' norm == identity, then flatten
    in_features, out_features = weight_t.shape
    assert x2d.shape[1] == in_features, "flattened input does not match weight in_features"

    w = weight_t.astype(compute_dtype)
    lo = clip_values[:, 0].astype(jnp.float32)
    hi = clip_values[:, 1].astype(jnp.float32)

    if use_xla_fallback:
        y = jnp.dot(x2d, w, preferred_element_type=jnp.float32) + bias[None, :].astype(jnp.float32)
        return jnp.clip(y, lo[None, :], hi[None, :]).astype(out_dtype)

    # Pack bias / clip_min / clip_max into one (8, out_features) tile (rows 0/1/2):
    # a single small parameter DMA instead of three tiny ones.
    params = jnp.zeros((8, out_features), jnp.float32)
    params = params.at[0, :].set(bias.astype(jnp.float32))
    params = params.at[1, :].set(lo)
    params = params.at[2, :].set(hi)

    itemsize = jnp.dtype(compute_dtype).itemsize
    cost = pl.CostEstimate(
        flops=2 * n * in_features * out_features,
        transcendentals=0,
        bytes_accessed=(n * in_features * itemsize
                        + in_features * out_features * itemsize
                        + 8 * out_features * 4
                        + n * out_features * jnp.dtype(out_dtype).itemsize),
    )

    if n <= block_n:
        # Small/medium batch: single invocation, no grid, everything resident in VMEM.
        return pl.pallas_call(
            _offsetnet_kernel,
            out_shape=jax.ShapeDtypeStruct((n, out_features), out_dtype),
            cost_estimate=cost,
        )(x2d, w, params)

    # Large-batch path: tile the batch dimension.  Cap the tile so there are at
    # least 2 grid steps (v7x: both TensorCores get work); round the tile to a
    # sublane multiple of 8.  No input padding: Pallas handles the ragged last
    # block (tail reads are don't-care, tail writes past n are dropped).
    bn = min(block_n, ((pl.cdiv(n, 2) + 7) // 8) * 8)
    grid = (pl.cdiv(n, bn),)

    return pl.pallas_call(
        _offsetnet_kernel,
        out_shape=jax.ShapeDtypeStruct((n, out_features), out_dtype),
        grid=grid,
        in_specs=[
            pl.BlockSpec((bn, in_features), lambda i: (i, 0)),
            pl.BlockSpec((in_features, out_features), lambda i: (0, 0)),
            pl.BlockSpec((8, out_features), lambda i: (0, 0)),
        ],
        out_specs=pl.BlockSpec((bn, out_features), lambda i: (i, 0)),
        compiler_params=pltpu.CompilerParams(
            dimension_semantics=("parallel",)),
        cost_estimate=cost,
    )(x2d, w, params)


def _reference_forward(x, weight_t, bias, clip_values):
    n = x.shape[0]
    x2d = x.reshape(n, -1).astype(jnp.float32)
    y = x2d @ weight_t.astype(jnp.float32) + bias[None, :].astype(jnp.float32)
    return jnp.clip(y, clip_values[None, :, 0], clip_values[None, :, 1])


if __name__ == "__main__":
    # Shapes implied by the module: x is (batch, K, 2) landmark-offset style input,
    # flattened to in_channels = K * 2 features.
    num_points = 16
    in_channels = num_points * 2   # 32
    out_channels = 16

    key = jax.random.PRNGKey(0)
    kx, kw, kb, kx2 = jax.random.split(key, 4)

    # Deterministic Linear parameters (mimic nn.Linear's uniform(-1/sqrt(fan_in), 1/sqrt(fan_in))).
    bound = 1.0 / jnp.sqrt(jnp.float32(in_channels))
    weight_t = jax.random.uniform(kw, (in_channels, out_channels),
                                  minval=-bound, maxval=bound, dtype=jnp.float32)
    bias = jax.random.uniform(kb, (out_channels,),
                              minval=-bound, maxval=bound, dtype=jnp.float32)

    # The module's __init__ buffer is ones((out,2)) (would clamp everything to 1.0);
    # use set_attr-style values [-1, +1] per channel for a meaningful demo.
    clip_values = jnp.stack(
        [-jnp.ones((out_channels,), jnp.float32),
         jnp.ones((out_channels,), jnp.float32)], axis=1)
    assert bool(jnp.all(clip_values[:, 0] <= clip_values[:, 1])), \
        "clip_values min must be <= max per channel (torch.clip precondition)"

    # ---- small-batch path (single call, no grid, exact f32) ----
    batch = 8
    x = jax.random.normal(kx, (batch, num_points, 2), dtype=jnp.float32)
    y = jax.block_until_ready(offsetnet_forward(x, weight_t, bias, clip_values))
    y_ref = _reference_forward(x, weight_t, bias, clip_values)
    assert y.shape == (batch, out_channels)
    assert jnp.max(jnp.abs(y - y_ref)) < 1e-5, "Pallas (small-batch) mismatch vs reference"

    # ---- batch-tiled path with ragged tail (no padded-x copy), exact f32 ----
    big_batch = 2000                      # not a multiple of the tile -> exercises ragged tail
    xb = jax.random.normal(kx2, (big_batch, num_points, 2), dtype=jnp.float32)
    yb = jax.block_until_ready(
        offsetnet_forward(xb, weight_t, bias, clip_values, block_n=512))
    yb_ref = _reference_forward(xb, weight_t, bias, clip_values)
    assert yb.shape == (big_batch, out_channels)
    assert jnp.max(jnp.abs(yb - yb_ref)) < 1e-5, "Pallas (tiled, ragged tail) mismatch vs reference"

    # ---- bf16-input path (recommended for inference on v5e/v6e/v7x) ----
    yb16 = jax.block_until_ready(
        offsetnet_forward(xb, weight_t, bias, clip_values, block_n=512,
                          compute_dtype=jnp.bfloat16))
    assert jnp.max(jnp.abs(yb16 - yb_ref)) < 3e-2, "Pallas (bf16 inputs) mismatch vs reference"

    print("KERNEL_OK")
</pallas_src>

<mosaic_0001>
module attributes {stable_mosaic.version = 11 : i64} {
  func.func @_offsetnet_kernel(%arg0: memref<8x32xf32, #tpu.memory_space<vmem>>, %arg1: memref<32x16xf32, #tpu.memory_space<vmem>>, %arg2: memref<8x16xf32, #tpu.memory_space<vmem>>, %arg3: memref<8x16xf32, #tpu.memory_space<vmem>>) attributes {dimension_semantics = [], scalar_prefetch = 0 : i64, scratch_operands = 0 : i64, tpu.core_type = #tpu.core_type<tc>} {
    %c0 = arith.constant 0 : index
    %c0_0 = arith.constant 0 : index
    %0 = vector.load %arg0[%c0, %c0_0] : memref<8x32xf32, #tpu.memory_space<vmem>>, vector<8x32xf32>
    %c0_1 = arith.constant 0 : index
    %c0_2 = arith.constant 0 : index
    %1 = vector.load %arg1[%c0_1, %c0_2] : memref<32x16xf32, #tpu.memory_space<vmem>>, vector<32x16xf32>
    %cst = arith.constant dense<0.000000e+00> : vector<8x16xf32>
    %2 = tpu.matmul %0, %1, %cst {dimension_numbers = #tpu.dot_dimension_numbers<[1], [0], [0], [1], [0, 0, 1, 1], [], []>} : vector<8x32xf32>, vector<32x16xf32>, vector<8x16xf32> -> vector<8x16xf32>
    %c0_3 = arith.constant 0 : index
    %c0_4 = arith.constant 0 : index
    %3 = vector.load %arg2[%c0_3, %c0_4] : memref<8x16xf32, #tpu.memory_space<vmem>>, vector<1x16xf32>
    %4 = vector.broadcast %3 : vector<1x16xf32> to vector<8x16xf32>
    %5 = arith.addf %2, %4 : vector<8x16xf32>
    %c1 = arith.constant 1 : index
    %c0_5 = arith.constant 0 : index
    %6 = vector.load %arg2[%c1, %c0_5] : memref<8x16xf32, #tpu.memory_space<vmem>>, vector<1x16xf32>
    %7 = vector.broadcast %6 : vector<1x16xf32> to vector<8x16xf32>
    %8 = arith.maximumf %5, %7 : vector<8x16xf32>
    %c2 = arith.constant 2 : index
    %c0_6 = arith.constant 0 : index
    %9 = vector.load %arg2[%c2, %c0_6] : memref<8x16xf32, #tpu.memory_space<vmem>>, vector<1x16xf32>
    %10 = vector.broadcast %9 : vector<1x16xf32> to vector<8x16xf32>
    %11 = arith.minimumf %8, %10 : vector<8x16xf32>
    %c0_7 = arith.constant 0 : index
    %c0_8 = arith.constant 0 : index
    %12 = vector.load %arg3[%c0_7, %c0_8] : memref<8x16xf32, #tpu.memory_space<vmem>>, vector<8x16xf32>
    tpu.vector_store %arg3[%c0_7, %c0_8], %11 {strides = array<i32>} : memref<8x16xf32, #tpu.memory_space<vmem>>, vector<8x16xf32>,
    return
  }
}

</mosaic_0001>

<bundles_post_ra>
// kernel: tpu_custom_call.1
= control target key start
LH: loop header
LB: loop body
LE: loop exit
PB: predicated region body
PF: predicated region fallthrough
CT: control target
= control target key end

     0   :  { %v181_v3 = vmov 0.0|0.0   ;;  %vm182_vm0 = vmmov 0   ;;  %v183_v6 = vmov 0.0   ;;  %s241_s0 = inlined_call_operand.vmem [shape: f32[8,32], index: 0, kind: input, shape index: {}]   ;;  %s242_s1 = inlined_call_operand.vmem [shape: f32[32,16], index: 1, kind: input, shape index: {}]   ;;  %s243_s2 = inlined_call_operand.vmem [shape: f32[8,16], index: 2, kind: input, shape index: {}]   ;;  %s244_s3 = inlined_call_operand.hbm [shape: f32[8,16], index: 3, kind: output, shape index: {}]  }
   0x1   :  { %v16_v0 = vld [vmem:[%s242_s1] sm:$0xff]  ;;  %v17_v1 = vld [vmem:[%s242_s1 + $0x8] sm:$0xff]  ;;  %v18_v2 = vld [vmem:[%s242_s1 + $0x10] sm:$0xff]  ;;  %147 = vmatprep.subr.bf16.mxu0 %v181_v3  ;;  %144 = vmatprep.mubr.msk.f32.mxu0 %vm182_vm0, %v183_v6 }
   0x2   :  { %v148_v4 = vpack.c.bf16 %v17_v1, %v16_v0  ;;  %v19_v5 = vld [vmem:[%s242_s1 + $0x18] sm:$0xff] }
   0x3   :  { %8 = vsyncpa [#allocation3], 0  ;;  %v151_v7 = vpack.c.bf16 %v19_v5, %v18_v2  ;;  %v15_v8 = vld [vmem:[%s241_s0] sm:$0xff]  ;;  %vm25_vm1 = vcmask 261120   ;;  %s184_s27 = smov [#allocation2]   ;;  %vm111_vm2 = vcmask 130048  }
   0x4   :  { %149 = vmatpush3.bf16.msra.mxu0 %v148_v4  ;;  %v127_v9 = vld [vmem:[%s243_s2] ss:$0 sm:$0xff]  ;;  %v129_v11 = vld [vmem:[%s243_s2 + $0x1] ss:$0 sm:$0xff]  ;;  %v130_v14 = vld [vmem:[%s243_s2 + $0x2] ss:$0 sm:$0xff] }
   0x5   :  { %150 = vmatprep.subr.bf16.mxu0 %v181_v3  ;;  %s119_s28 = sshll.u32 %s184_s27, 4  ;;  %s120_s28 = int_to_ptr.vmem [resolvable:$true] %s119_s28 }
   0x6   :  { %s157_s0 = scalar_lea.vmem %s120_s28, 128  ;;  %p162_p1 = scmp.lt.s32.totalorder %s120_s28, %s120_s28 }
   0x7   :  { %p158_p0 = scmp.ne.s32.totalorder %s120_s28, %s157_s0  ;;  %p163_p2 = scmp.lt.s32.totalorder %s157_s0, %s157_s0 }
   0x8   :  { %152 = vmatpush3.bf16.msra.mxu0 %v151_v7 }
   0x9   :  { %p164_p3 = por %p163_p2, %p162_p1 }
   0xb   :  { %145 = vmatmul.mubr.msk.f32.vlgmr.msra.gmra.mrb[0].mxu0 %vm25_vm1, %v15_v8  ;;  %p165_p4 = pnand %p164_p3, %p158_p0 }
  0xde   :  { %v95_v10 = vpop.f32.mrb[0].mxu0 }
  0xdf   :  { %v96_v12 = vadd.f32 %v127_v9, %v95_v10  ;;  %v146_v13 = vpop.f32.mrb[1].mxu0 }
  0xe1   :  { %v104_v15 = vmax.f32 %v96_v12, %v129_v11 }
  0xe3   :  { %v110_v16 = vmin.f32 %v104_v15, %v130_v14 }
  0xe5   :  { %112 = vst.msk [vmem:[#allocation2] sm:$0xff] %vm111_vm2, %v110_v16 }
  0xe6   :  { %168 = shalt.err (!%p165_p4)
}
  0xe7   :  { %s169_s4 = scalar_lea.hbm %s244_s3, 128 }
  0xe8   :  { %p170_p5 = scmp.ne.s32.totalorder %s244_s3, %s169_s4  ;;  %p173_p6 = scmp.lt.u32.totalorder %s169_s4, %s244_s3 }
  0xea   :  { %p175_p7 = pnand %p173_p6, %p170_p5 }
  0xec   :  { %178 = shalt.err (!%p175_p7)
}
  0xed   :  { %122 = dma.vmem_to_hbm [thread:$0]  %s120_s28, 128, %s244_s3, [#allocation3]  }
  0xee   :  { %179 = dma.done.wait [#allocation3], 128  }
  0xef   :  { %180 = vsyncadd [#allocation3], 4294967168 }
  0xf0   :  { %126 = vsyncpa [#allocation3], 1 }

</bundles_post_ra>
